<compile_context>
chip_gen: v7x
topology: tpu7x:2x2x1
jax: 0.10.0
libtpu: 0.0.40
codegen_flags: <defaults>
</compile_context>

<pallas_src>
import jax
import jax.numpy as jnp
from jax.experimental import pallas as pl
from jax.experimental.pallas import tpu as pltpu

IN_FEATURES = 28 * 28      # 784, fixed by the module
K_PAD = 1024               # contraction dim padded to a clean MXU multiple
HIDDEN_DIM = 256           # lane-aligned stand-in for the default 500
Z_DIM = 32                 # lane-aligned stand-in for the default 20
Z_PAD = 64                 # mean / logvar each padded to 64 lanes
HEAD_DIM = 2 * Z_PAD       # 128: fused (mean | std) output = one full lane tile


def _round_up(n, m):
    return (n + m - 1) // m * m


def encoder_kernel(x_ref, wh_ref, bh_ref, whead_ref, bhead_ref, out_ref):
    """Fused encoder tile: out[:, :Z_PAD] = mean, out[:, Z_PAD:] = std."""
    # Hidden layer: bf16 MXU matmul with f32 accumulation; bias + tanh in f32.
    h = jnp.tanh(
        jnp.dot(x_ref[...], wh_ref[...], preferred_element_type=jnp.float32)
        + bh_ref[...]
    )
    # Fused mu|logvar head: one [HIDDEN, 128] bf16 matmul instead of two N=32.
    head = (
        jnp.dot(h.astype(jnp.bfloat16), whead_ref[...],
                preferred_element_type=jnp.float32)
        + bhead_ref[...]
    )
    # Left 64 lanes are mean; right 64 lanes are logvar -> std = exp(0.5*logvar).
    # (jnp.where keeps the whole 128-lane vreg dense; exp runs on the EUP slot.)
    cols = jax.lax.broadcasted_iota(jnp.int32, head.shape, 1)
    out_ref[...] = jnp.where(cols < Z_PAD, head,
                             jnp.exp(0.5 * head)).astype(out_ref.dtype)


def _prepare_params(params):
    """Cast to bf16 MXU operands, pad K 784->1024, fuse mu/var heads."""
    wh, bh, wmu, bmu, wvar, bvar = params
    wh_p = jnp.zeros((K_PAD, HIDDEN_DIM), jnp.bfloat16)
    wh_p = wh_p.at[:IN_FEATURES, :].set(wh.astype(jnp.bfloat16))

    whead = jnp.zeros((HIDDEN_DIM, HEAD_DIM), jnp.bfloat16)
    whead = whead.at[:, :Z_DIM].set(wmu.astype(jnp.bfloat16))
    whead = whead.at[:, Z_PAD:Z_PAD + Z_DIM].set(wvar.astype(jnp.bfloat16))

    bhead = jnp.zeros((1, HEAD_DIM), jnp.float32)
    bhead = bhead.at[:, :Z_DIM].set(bmu.astype(jnp.float32))
    bhead = bhead.at[:, Z_PAD:Z_PAD + Z_DIM].set(bvar.astype(jnp.float32))

    return wh_p, bh.astype(jnp.float32), whead, bhead


def encoder_forward(x, params, *, batch_tile=256):
    """x: [B, IN_FEATURES] float32 -> (mean [B, Z_DIM], std [B, Z_DIM])."""
    wh_p, bh, whead, bhead = _prepare_params(params)

    B = x.shape[0]
    tm = min(_round_up(batch_tile, 8), _round_up(B, 8))
    B_pad = _round_up(B, tm)
    grid = (B_pad // tm,)

    # Zero-pad batch tail and contraction dim; cast x to bf16 (halves HBM traffic).
    x_p = jnp.zeros((B_pad, K_PAD), jnp.bfloat16)
    x_p = x_p.at[:B, :IN_FEATURES].set(x.astype(jnp.bfloat16))

    full = lambda shape: pl.BlockSpec(shape, lambda i: (0, 0))

    fused = pl.pallas_call(
        encoder_kernel,
        out_shape=jax.ShapeDtypeStruct((B_pad, HEAD_DIM), jnp.float32),
        grid_spec=pltpu.PrefetchScalarGridSpec(
            num_scalar_prefetch=0,
            grid=grid,
            in_specs=[
                pl.BlockSpec((tm, K_PAD), lambda i: (i, 0)),   # x tile (bf16)
                full((K_PAD, HIDDEN_DIM)),                      # W_h (bf16)
                full((1, HIDDEN_DIM)),                          # b_h (f32)
                full((HIDDEN_DIM, HEAD_DIM)),                   # W_mu|W_var (bf16)
                full((1, HEAD_DIM)),                            # b_mu|b_var (f32)
            ],
            out_specs=pl.BlockSpec((tm, HEAD_DIM), lambda i: (i, 0)),
        ),
        compiler_params=pltpu.CompilerParams(
            dimension_semantics=("parallel",),   # multi-step grid shards across v7x's 2 TCs
        ),
    )(x_p, wh_p, bh, whead, bhead)

    mean = fused[:B, :Z_DIM]
    std = fused[:B, Z_PAD:Z_PAD + Z_DIM]
    return mean, std


def init_params(key):
    """Deterministic synthetic parameters (PyTorch nn.Linear-style uniform init)."""
    ks = jax.random.split(key, 6)

    def linear(kw, kb, fan_in, fan_out):
        bound = 1.0 / jnp.sqrt(fan_in)
        w = jax.random.uniform(kw, (fan_in, fan_out), jnp.float32, -bound, bound)
        b = jax.random.uniform(kb, (1, fan_out), jnp.float32, -bound, bound)
        return w, b

    wh, bh = linear(ks[0], ks[1], IN_FEATURES, HIDDEN_DIM)
    wmu, bmu = linear(ks[2], ks[3], HIDDEN_DIM, Z_DIM)
    wvar, bvar = linear(ks[4], ks[5], HIDDEN_DIM, Z_DIM)
    return wh, bh, wmu, bmu, wvar, bvar


def encoder_reference(x, params):
    """Pure-JAX reference using the same bf16 operands / f32 accumulation."""
    wh, bh, wmu, bmu, wvar, bvar = params
    xb = x.astype(jnp.bfloat16)
    h = jnp.tanh(
        jnp.dot(xb, wh.astype(jnp.bfloat16), preferred_element_type=jnp.float32) + bh
    )
    hb = h.astype(jnp.bfloat16)
    mean = jnp.dot(hb, wmu.astype(jnp.bfloat16),
                   preferred_element_type=jnp.float32) + bmu
    logvar = jnp.dot(hb, wvar.astype(jnp.bfloat16),
                     preferred_element_type=jnp.float32) + bvar
    return mean, jnp.sqrt(jnp.exp(logvar))


if __name__ == "__main__":
    key = jax.random.PRNGKey(0)
    k_param, k_x1, k_x2 = jax.random.split(key, 3)
    params = init_params(k_param)

    # Small sanity batch (single grid step).
    B = 16
    x = jax.random.uniform(k_x1, (B, IN_FEATURES), jnp.float32)
    mean, std = encoder_forward(x, params)
    jax.block_until_ready((mean, std))
    ref_mean, ref_std = encoder_reference(x, params)
    assert mean.shape == (B, Z_DIM) and std.shape == (B, Z_DIM)
    assert jnp.allclose(mean, ref_mean, atol=2e-3, rtol=2e-3)
    assert jnp.allclose(std, ref_std, atol=2e-3, rtol=2e-3)

    # Ragged batch: exercises cdiv grid, tail zero-padding and a multi-step
    # parallel grid (sharded across TensorCores on v7x).
    B2 = 300
    x2 = jax.random.uniform(k_x2, (B2, IN_FEATURES), jnp.float32)
    mean2, std2 = encoder_forward(x2, params, batch_tile=128)
    jax.block_until_ready((mean2, std2))
    ref_mean2, ref_std2 = encoder_reference(x2, params)
    assert mean2.shape == (B2, Z_DIM) and std2.shape == (B2, Z_DIM)
    assert jnp.allclose(mean2, ref_mean2, atol=2e-3, rtol=2e-3)
    assert jnp.allclose(std2, ref_std2, atol=2e-3, rtol=2e-3)

    print("KERNEL_OK")
</pallas_src>

<mosaic_0001>
module attributes {stable_mosaic.version = 11 : i64} {
  func.func @encoder_kernel(%arg0: i32, %arg1: memref<16x1024xbf16, #tpu.memory_space<vmem>>, %arg2: memref<1024x256xbf16, #tpu.memory_space<vmem>>, %arg3: memref<1x256xf32, #tpu.memory_space<vmem>>, %arg4: memref<256x128xbf16, #tpu.memory_space<vmem>>, %arg5: memref<1x128xf32, #tpu.memory_space<vmem>>, %arg6: memref<16x128xf32, #tpu.memory_space<vmem>>) attributes {dimension_semantics = [#tpu.dimension_semantics<parallel>], iteration_bounds = array<i64: 1>, scalar_prefetch = 0 : i64, scratch_operands = 0 : i64, tpu.core_type = #tpu.core_type<tc>, window_params = [{transform_indices = @transform_0, window_bounds = array<i64: 16, 1024>}, {pipeline_mode = #tpu.pipeline_mode<synchronous>, transform_indices = @transform_1, window_bounds = array<i64: 1024, 256>}, {pipeline_mode = #tpu.pipeline_mode<synchronous>, transform_indices = @transform_2, window_bounds = array<i64: 1, 256>}, {pipeline_mode = #tpu.pipeline_mode<synchronous>, transform_indices = @transform_3, window_bounds = array<i64: 256, 128>}, {pipeline_mode = #tpu.pipeline_mode<synchronous>, transform_indices = @transform_4, window_bounds = array<i64: 1, 128>}, {transform_indices = @transform_5, window_bounds = array<i64: 16, 128>}]} {
    %c0 = arith.constant 0 : index
    %c0_0 = arith.constant 0 : index
    %0 = vector.load %arg1[%c0, %c0_0] : memref<16x1024xbf16, #tpu.memory_space<vmem>>, vector<16x1024xbf16>
    %c0_1 = arith.constant 0 : index
    %c0_2 = arith.constant 0 : index
    %1 = vector.load %arg2[%c0_1, %c0_2] : memref<1024x256xbf16, #tpu.memory_space<vmem>>, vector<1024x256xbf16>
    %cst = arith.constant dense<0.000000e+00> : vector<16x256xf32>
    %2 = tpu.matmul %0, %1, %cst {dimension_numbers = #tpu.dot_dimension_numbers<[1], [0], [0], [1], [0, 0, 1, 1], [], []>} : vector<16x1024xbf16>, vector<1024x256xbf16>, vector<16x256xf32> -> vector<16x256xf32>
    %c0_3 = arith.constant 0 : index
    %c0_4 = arith.constant 0 : index
    %3 = vector.load %arg3[%c0_3, %c0_4] : memref<1x256xf32, #tpu.memory_space<vmem>>, vector<1x256xf32>
    %4 = vector.broadcast %3 : vector<1x256xf32> to vector<16x256xf32>
    %5 = arith.addf %2, %4 : vector<16x256xf32>
    %6 = math.tanh %5 : vector<16x256xf32>
    %7 = arith.truncf %6 : vector<16x256xf32> to vector<16x256xbf16>
    %c0_5 = arith.constant 0 : index
    %c0_6 = arith.constant 0 : index
    %8 = vector.load %arg4[%c0_5, %c0_6] : memref<256x128xbf16, #tpu.memory_space<vmem>>, vector<256x128xbf16>
    %cst_7 = arith.constant dense<0.000000e+00> : vector<16x128xf32>
    %9 = tpu.matmul %7, %8, %cst_7 {dimension_numbers = #tpu.dot_dimension_numbers<[1], [0], [0], [1], [0, 0, 1, 1], [], []>} : vector<16x256xbf16>, vector<256x128xbf16>, vector<16x128xf32> -> vector<16x128xf32>
    %c0_8 = arith.constant 0 : index
    %c0_9 = arith.constant 0 : index
    %10 = vector.load %arg5[%c0_8, %c0_9] : memref<1x128xf32, #tpu.memory_space<vmem>>, vector<1x128xf32>
    %11 = vector.broadcast %10 : vector<1x128xf32> to vector<16x128xf32>
    %12 = arith.addf %9, %11 : vector<16x128xf32>
    %13 = tpu.iota {dimensions = array<i32: 1>} : vector<16x128xi32>
    %c64_i32 = arith.constant 64 : i32
    %14 = vector.broadcast %c64_i32 : i32 to vector<16x128xi32>
    %15 = arith.cmpi slt, %13, %14 : vector<16x128xi32>
    %cst_10 = arith.constant 5.000000e-01 : f32
    %16 = vector.broadcast %cst_10 : f32 to vector<16x128xf32>
    %17 = arith.mulf %16, %12 : vector<16x128xf32>
    %18 = math.exp %17 : vector<16x128xf32>
    %19 = arith.select %15, %12, %18 : vector<16x128xi1>, vector<16x128xf32>
    %c0_11 = arith.constant 0 : index
    %c0_12 = arith.constant 0 : index
    %20 = vector.load %arg6[%c0_11, %c0_12] : memref<16x128xf32, #tpu.memory_space<vmem>>, vector<16x128xf32>
    tpu.vector_store %arg6[%c0_11, %c0_12], %19 {strides = array<i32>} : memref<16x128xf32, #tpu.memory_space<vmem>>, vector<16x128xf32>,
    return
  }
  func.func @transform_0(%arg0: i32) -> (i32, i32) {
    %c0_i32 = arith.constant 0 : i32
    %c0_i32_0 = arith.constant 0 : i32
    return %arg0, %c0_i32 : i32, i32
  }
  func.func @transform_1(%arg0: i32) -> (i32, i32) {
    %c0_i32 = arith.constant 0 : i32
    %c0_i32_0 = arith.constant 0 : i32
    %c0_i32_1 = arith.constant 0 : i32
    return %c0_i32, %c0_i32_0 : i32, i32
  }
  func.func @transform_2(%arg0: i32) -> (i32, i32) {
    %c0_i32 = arith.constant 0 : i32
    %c0_i32_0 = arith.constant 0 : i32
    %c0_i32_1 = arith.constant 0 : i32
    return %c0_i32, %c0_i32_0 : i32, i32
  }
  func.func @transform_3(%arg0: i32) -> (i32, i32) {
    %c0_i32 = arith.constant 0 : i32
    %c0_i32_0 = arith.constant 0 : i32
    %c0_i32_1 = arith.constant 0 : i32
    return %c0_i32, %c0_i32_0 : i32, i32
  }
  func.func @transform_4(%arg0: i32) -> (i32, i32) {
    %c0_i32 = arith.constant 0 : i32
    %c0_i32_0 = arith.constant 0 : i32
    %c0_i32_1 = arith.constant 0 : i32
    return %c0_i32, %c0_i32_0 : i32, i32
  }
  func.func @transform_5(%arg0: i32) -> (i32, i32) {
    %c0_i32 = arith.constant 0 : i32
    %c0_i32_0 = arith.constant 0 : i32
    return %arg0, %c0_i32 : i32, i32
  }
}

</mosaic_0001>

<bundles_post_ra>
// kernel: tpu_custom_call.1
= control target key start
LH: loop header
LB: loop body
LE: loop exit
PB: predicated region body
PF: predicated region fallthrough
CT: control target
= control target key end

     0   :  { %10 = vsyncpa [#allocation3], 0  ;;  %s1907_s0 = inlined_call_operand.hbm [shape: bf16[16,1024], index: 0, kind: input, shape index: {}]   ;;  %s1908_s1 = inlined_call_operand.hbm [shape: bf16[1024,256], index: 1, kind: input, shape index: {}]   ;;  %s1909_s2 = inlined_call_operand.vmem [shape: f32[1,256], index: 2, kind: input, shape index: {}]   ;;  %s1910_s3 = inlined_call_operand.hbm [shape: bf16[256,128], index: 3, kind: input, shape index: {}]   ;;  %s1911_s4 = inlined_call_operand.vmem [shape: f32[1,128], index: 4, kind: input, shape index: {}]   ;;  %s1912_s5 = inlined_call_operand.hbm [shape: f32[16,128], index: 5, kind: output, shape index: {}]  }
   0x1   :  { %11 = vsyncpa [#allocation6], 0 }
   0x2   :  { %12 = vsyncpa [#allocation4], 0  ;;  %s1791_s18 = smov [#allocation5]   ;;  %s1697_s22 = scalar_lea.hbm %s1908_s1, 16384 }
   0x3   :  { %s30_s19 = sshll.u32 %s1791_s18, 4  ;;  %p1698_p0 = scmp.ne.s32.totalorder %s1908_s1, %s1697_s22  ;;  %s31_s19 = int_to_ptr.vmem [resolvable:$true] %s30_s19 }
   0x4   :  { %p1701_p1 = scmp.lt.u32.totalorder %s1697_s22, %s1908_s1 }
   0x6   :  { %p1703_p2 = pnand %p1701_p1, %p1698_p0 }
   0x8   :  { %1706 = shalt.err (!%p1703_p2)
}
   0x9   :  { %s1707_s27 = scalar_lea.vmem %s31_s19, 16384  ;;  %p1712_p4 = scmp.lt.s32.totalorder %s31_s19, %s31_s19 }
   0xa   :  { %p1708_p3 = scmp.ne.s32.totalorder %s31_s19, %s1707_s27  ;;  %p1713_p5 = scmp.lt.s32.totalorder %s1707_s27, %s1707_s27 }
   0xc   :  { %p1714_p6 = por %p1713_p5, %p1712_p4 }
   0xe   :  { %p1715_p7 = pnand %p1714_p6, %p1708_p3 }
  0x10   :  { %1718 = shalt.err (!%p1715_p7)
}
  0x11   :  { %s1792_s28 = smov 128   ;;  %s1793_s29 = smov 8  }
  0x12   :  { %36 = dma.hbm_to_vmem [thread:$0]  %s1908_s1, 16384, %s31_s19, [#allocation6], %s1792_s28, %s1792_s28, %s1793_s29  }
  0x13   :  { %s1794_s7 = smov [#allocation2]   ;;  %s1719_s11 = scalar_lea.hbm %s1907_s0, 1024 }
  0x14   :  { %s18_s8 = sshll.u32 %s1794_s7, 4  ;;  %p1720_p8 = scmp.ne.s32.totalorder %s1907_s0, %s1719_s11  ;;  %s19_s8 = int_to_ptr.vmem [resolvable:$true] %s18_s8 }
  0x15   :  { %p1723_p9 = scmp.lt.u32.totalorder %s1719_s11, %s1907_s0 }
  0x17   :  { %p1725_p10 = pnand %p1723_p9, %p1720_p8 }
  0x19   :  { %1728 = shalt.err (!%p1725_p10)
}
  0x1a   :  { %s1729_s16 = scalar_lea.vmem %s19_s8, 1024  ;;  %p1734_p12 = scmp.lt.s32.totalorder %s19_s8, %s19_s8 }
  0x1b   :  { %p1730_p11 = scmp.ne.s32.totalorder %s19_s8, %s1729_s16  ;;  %p1735_p13 = scmp.lt.s32.totalorder %s1729_s16, %s1729_s16 }
  0x1d   :  { %p1736_p0 = por %p1735_p13, %p1734_p12 }
  0x1f   :  { %p1737_p1 = pnand %p1736_p0, %p1730_p11 }
  0x21   :  { %1740 = shalt.err (!%p1737_p1)
}
  0x22   :  { %s1795_s1 = smov 512   ;;  %s1796_s17 = smov 32  }
  0x23   :  { %24 = dma.hbm_to_vmem [thread:$0]  %s1907_s0, 1024, %s19_s8, [#allocation3], %s1795_s1, %s1795_s1, %s1796_s17  }
  0x24   :  { %s1797_s20 = smov [#allocation7]   ;;  %s1741_s24 = scalar_lea.hbm %s1910_s3, 2048 }
  0x25   :  { %s44_s21 = sshll.u32 %s1797_s20, 4  ;;  %p1742_p2 = scmp.ne.s32.totalorder %s1910_s3, %s1741_s24  ;;  %s45_s21 = int_to_ptr.vmem [resolvable:$true] %s44_s21 }
  0x26   :  { %p1745_p3 = scmp.lt.u32.totalorder %s1741_s24, %s1910_s3 }
  0x28   :  { %p1747_p4 = pnand %p1745_p3, %p1742_p2 }
  0x2a   :  { %1750 = shalt.err (!%p1747_p4)
}
  0x2b   :  { %s1751_s6 = scalar_lea.vmem %s45_s21, 2048  ;;  %p1756_p6 = scmp.lt.s32.totalorder %s45_s21, %s45_s21 }
  0x2c   :  { %p1752_p5 = scmp.ne.s32.totalorder %s45_s21, %s1751_s6  ;;  %p1757_p7 = scmp.lt.s32.totalorder %s1751_s6, %s1751_s6 }
  0x2e   :  { %p1758_p8 = por %p1757_p7, %p1756_p6 }
  0x30   :  { %p1759_p9 = pnand %p1758_p8, %p1752_p5 }
  0x32   :  { %1762 = shalt.err (!%p1759_p9)
}
  0x33   :  { %s1798_s0 = smov 64   ;;  %s1799_s7 = smov 4  }
  0x34   :  { %50 = dma.hbm_to_vmem [thread:$0]  %s1910_s3, 2048, %s45_s21, [#allocation6], %s1798_s0, %s1798_s0, %s1799_s7  }
  0x35   :  { %1785 = dma.done.wait [#allocation3], 1024  }
  0x36   :  { %1786 = vsyncadd [#allocation3], 4294966272 }
  0x37   :  { %1787 = dma.done.wait [#allocation6], 18432  }
  0x38   :  { %1788 = vsyncadd [#allocation6], 4294948864  ;;  %v1477_v0 = vld [vmem:[#allocation5 + $0x4] ss:$8 sps:$4 sm:$0xff]   ;;  %v1481_v2 = vld [vmem:[#allocation5] ss:$8 sps:$4 sm:$0xff]  }
  0x39   :  { %v1479_v1 = vld [vmem:[#allocation5 + $0x204] ss:$8 sps:$4 sm:$0xff]   ;;  %891 = vmatprep.subr.bf16.mxu1 %v1477_v0  ;;  %v1482_v3 = vld [vmem:[#allocation5 + $0x200] ss:$8 sps:$4 sm:$0xff]   ;;  %v1483_v4 = vld [vmem:[#allocation5 + $0x14] ss:$8 sps:$4 sm:$0xff]  }
  0x3a   :  { %977 = vmatprep.subr.bf16.mxu0 %v1479_v1  ;;  %892 = vmatpush1.bf16.msra.mxu1 %v1481_v2  ;;  %v1485_v5 = vld [vmem:[#allocation5 + $0x214] ss:$8 sps:$4 sm:$0xff]   ;;  %v1487_v6 = vld [vmem:[#allocation5 + $0x10] ss:$8 sps:$4 sm:$0xff]   ;;  %v1489_v8 = vld [vmem:[#allocation5 + $0x24] ss:$8 sps:$4 sm:$0xff]  }
  0x3b   :  { %978 = vmatpush1.bf16.msra.mxu0 %v1482_v3  ;;  %893 = vmatprep.subr.bf16.mxu1 %v1483_v4  ;;  %v1488_v7 = vld [vmem:[#allocation5 + $0x210] ss:$8 sps:$4 sm:$0xff]   ;;  %v1491_v9 = vld [vmem:[#allocation5 + $0x224] ss:$8 sps:$4 sm:$0xff]   ;;  %v1493_v10 = vld [vmem:[#allocation5 + $0x20] ss:$8 sps:$4 sm:$0xff]  }
  0x3c   :  { %979 = vmatprep.subr.bf16.mxu0 %v1485_v5  ;;  %v1494_v11 = vld [vmem:[#allocation5 + $0x220] ss:$8 sps:$4 sm:$0xff]   ;;  %v1495_v12 = vld [vmem:[#allocation5 + $0x34] ss:$8 sps:$4 sm:$0xff]   ;;  %v1499_v14 = vld [vmem:[#allocation5 + $0x30] ss:$8 sps:$4 sm:$0xff]  }
  0x3d   :  { %v1497_v13 = vld [vmem:[#allocation5 + $0x234] ss:$8 sps:$4 sm:$0xff]   ;;  %v1500_v15 = vld [vmem:[#allocation5 + $0x230] ss:$8 sps:$4 sm:$0xff]   ;;  %v1501_v16 = vld [vmem:[#allocation5 + $0x44] ss:$8 sps:$4 sm:$0xff]  }
  0x3e   :  { %894 = vmatpush1.bf16.msra.mxu1 %v1487_v6  ;;  %v1503_v17 = vld [vmem:[#allocation5 + $0x244] ss:$8 sps:$4 sm:$0xff]   ;;  %v1505_v18 = vld [vmem:[#allocation5 + $0x40] ss:$8 sps:$4 sm:$0xff]   ;;  %v1507_v20 = vld [vmem:[#allocation5 + $0x54] ss:$8 sps:$4 sm:$0xff]  }
  0x3f   :  { %980 = vmatpush1.bf16.msra.mxu0 %v1488_v7  ;;  %895 = vmatprep.subr.bf16.mxu1 %v1489_v8  ;;  %v1506_v19 = vld [vmem:[#allocation5 + $0x240] ss:$8 sps:$4 sm:$0xff]   ;;  %v1509_v21 = vld [vmem:[#allocation5 + $0x254] ss:$8 sps:$4 sm:$0xff]   ;;  %v1511_v22 = vld [vmem:[#allocation5 + $0x50] ss:$8 sps:$4 sm:$0xff]  }
  0x40   :  { %981 = vmatprep.subr.bf16.mxu0 %v1491_v9  ;;  %v1512_v23 = vld [vmem:[#allocation5 + $0x250] ss:$8 sps:$4 sm:$0xff]   ;;  %v1513_v24 = vld [vmem:[#allocation5 + $0x64] ss:$8 sps:$4 sm:$0xff]   ;;  %v1517_v26 = vld [vmem:[#allocation5 + $0x60] ss:$8 sps:$4 sm:$0xff]  }
  0x41   :  { %v1515_v25 = vld [vmem:[#allocation5 + $0x264] ss:$8 sps:$4 sm:$0xff]   ;;  %v1518_v27 = vld [vmem:[#allocation5 + $0x260] ss:$8 sps:$4 sm:$0xff]   ;;  %v1519_v28 = vld [vmem:[#allocation5 + $0x74] ss:$8 sps:$4 sm:$0xff]  }
  0x42   :  { %896 = vmatpush1.bf16.msra.mxu1 %v1493_v10  ;;  %v1521_v29 = vld [vmem:[#allocation5 + $0x274] ss:$8 sps:$4 sm:$0xff]   ;;  %v1523_v30 = vld [vmem:[#allocation5 + $0x70] ss:$8 sps:$4 sm:$0xff]   ;;  %v1525_v32 = vld [vmem:[#allocation5 + $0x84] ss:$8 sps:$4 sm:$0xff]  }
  0x43   :  { %982 = vmatpush1.bf16.msra.mxu0 %v1494_v11  ;;  %897 = vmatprep.subr.bf16.mxu1 %v1495_v12  ;;  %v1524_v31 = vld [vmem:[#allocation5 + $0x270] ss:$8 sps:$4 sm:$0xff]   ;;  %v1527_v33 = vld [vmem:[#allocation5 + $0x284] ss:$8 sps:$4 sm:$0xff]   ;;  %v1529_v34 = vld [vmem:[#allocation5 + $0x80] ss:$8 sps:$4 sm:$0xff]  }
  0x44   :  { %983 = vmatprep.subr.bf16.mxu0 %v1497_v13  ;;  %v1530_v35 = vld [vmem:[#allocation5 + $0x280] ss:$8 sps:$4 sm:$0xff]   ;;  %v1531_v36 = vld [vmem:[#allocation5 + $0x94] ss:$8 sps:$4 sm:$0xff]   ;;  %v1535_v38 = vld [vmem:[#allocation5 + $0x90] ss:$8 sps:$4 sm:$0xff]  }
  0x45   :  { %v1533_v37 = vld [vmem:[#allocation5 + $0x294] ss:$8 sps:$4 sm:$0xff]   ;;  %v1536_v39 = vld [vmem:[#allocation5 + $0x290] ss:$8 sps:$4 sm:$0xff]   ;;  %v1537_v40 = vld [vmem:[#allocation5 + $0xa4] ss:$8 sps:$4 sm:$0xff]  }
  0x46   :  { %898 = vmatpush1.bf16.msra.mxu1 %v1499_v14  ;;  %v1539_v41 = vld [vmem:[#allocation5 + $0x2a4] ss:$8 sps:$4 sm:$0xff]   ;;  %v1541_v42 = vld [vmem:[#allocation5 + $0xa0] ss:$8 sps:$4 sm:$0xff]   ;;  %v1543_v44 = vld [vmem:[#allocation5 + $0xb4] ss:$8 sps:$4 sm:$0xff]  }
  0x47   :  { %984 = vmatpush1.bf16.msra.mxu0 %v1500_v15  ;;  %899 = vmatprep.subr.bf16.mxu1 %v1501_v16  ;;  %v1542_v43 = vld [vmem:[#allocation5 + $0x2a0] ss:$8 sps:$4 sm:$0xff]   ;;  %v1545_v45 = vld [vmem:[#allocation5 + $0x2b4] ss:$8 sps:$4 sm:$0xff]   ;;  %v1547_v46 = vld [vmem:[#allocation5 + $0xb0] ss:$8 sps:$4 sm:$0xff]  }
  0x48   :  { %985 = vmatprep.subr.bf16.mxu0 %v1503_v17  ;;  %v1548_v47 = vld [vmem:[#allocation5 + $0x2b0] ss:$8 sps:$4 sm:$0xff]   ;;  %v63_v48 = vld [vmem:[#allocation2] sm:$0xff]  ;;  %v1555_v58 = vld [vmem:[#allocation5 + $0xd4] ss:$8 sps:$4 sm:$0xff]   ;;  %s1800_s12 = smov [#allocation8]  }
  0x49   :  { %v67_v49 = vld [vmem:[#allocation2 + $0x20] sm:$0xff]  ;;  %v65_v53 = vld [vmem:[#allocation2 + $0x10] sm:$0xff]  ;;  %s1263_s13 = sshll.u32 %s1800_s12, 4  ;;  %s1264_s13 = int_to_ptr.vmem [resolvable:$true] %s1263_s13 }
  0x4a   :  { %900 = vmatpush1.bf16.msra.mxu1 %v1505_v18  ;;  %v1549_v50 = vld [vmem:[#allocation5 + $0xc4] ss:$8 sps:$4 sm:$0xff]   ;;  %v1277_v52 = vcombine.high %v63_v48, %v67_v49  ;;  %v69_v54 = vld [vmem:[#allocation2 + $0x30] sm:$0xff]  ;;  %v1553_v56 = vld [vmem:[#allocation5 + $0xc0] ss:$8 sps:$4 sm:$0xff]   ;;  %v1276_v8 = vcombine.low %v63_v48, %v67_v49  ;;  %p1768_p11 = scmp.lt.s32.totalorder %s1264_s13, %s1264_s13 }
  0x4b   :  { %986 = vmatpush1.bf16.msra.mxu0 %v1506_v19  ;;  %901 = vmatprep.subr.bf16.mxu1 %v1507_v20  ;;  %v1551_v51 = vld [vmem:[#allocation5 + $0x2c4] ss:$8 sps:$4 sm:$0xff]   ;;  %v1281_v55 = vcombine.high %v65_v53, %v69_v54  ;;  %v1554_v57 = vld [vmem:[#allocation5 + $0x2c0] ss:$8 sps:$4 sm:$0xff]   ;;  %v1557_v59 = vld [vmem:[#allocation5 + $0x2d4] ss:$8 sps:$4 sm:$0xff]   ;;  %v1280_v10 = vcombine.low %v65_v53, %v69_v54 }
  0x4c   :  { %987 = vmatprep.subr.bf16.mxu0 %v1509_v21  ;;  %923 = vmatprep.mubr.bf16.mxu1 %v1277_v52  ;;  %v1559_v60 = vld [vmem:[#allocation5 + $0xd0] ss:$8 sps:$4 sm:$0xff]   ;;  %v1561_v62 = vld [vmem:[#allocation5 + $0xe4] ss:$8 sps:$4 sm:$0xff]   ;;  %v1565_v0 = vld [vmem:[#allocation5 + $0xe0] ss:$8 sps:$4 sm:$0xff]  }
  0x4d   :  { %1009 = vmatprep.mubr.bf16.mxu0 %v1281_v55  ;;  %v1560_v61 = vld [vmem:[#allocation5 + $0x2d0] ss:$8 sps:$4 sm:$0xff]   ;;  %v1563_v63 = vld [vmem:[#allocation5 + $0x2e4] ss:$8 sps:$4 sm:$0xff]   ;;  %v1566_v1 = vld [vmem:[#allocation5 + $0x2e0] ss:$8 sps:$4 sm:$0xff]  }
  0x4e   :  { %902 = vmatpush1.bf16.msra.mxu1 %v1511_v22  ;;  %v1567_v2 = vld [vmem:[#allocation5 + $0xf4] ss:$8 sps:$4 sm:$0xff]   ;;  %v1571_v4 = vld [vmem:[#allocation5 + $0xf0] ss:$8 sps:$4 sm:$0xff]   ;;  %v1575_v6 = vld [vmem:[#allocation5 + $0x104] ss:$8 sps:$4 sm:$0xff]  }
  0x4f   :  { %988 = vmatpush1.bf16.msra.mxu0 %v1512_v23  ;;  %903 = vmatprep.subr.bf16.mxu1 %v1513_v24  ;;  %v1569_v3 = vld [vmem:[#allocation5 + $0x2f4] ss:$8 sps:$4 sm:$0xff]   ;;  %v1572_v5 = vld [vmem:[#allocation5 + $0x2f0] ss:$8 sps:$4 sm:$0xff]   ;;  %v1578_v7 = vld [vmem:[#allocation5 + $0x304] ss:$8 sps:$4 sm:$0xff]  }
  0x50   :  { %989 = vmatprep.subr.bf16.mxu0 %v1515_v25  ;;  %v1573_v9 = vld [vmem:[#allocation5 + $0x100] ss:$8 sps:$4 sm:$0xff]   ;;  %v1581_v12 = vld [vmem:[#allocation5 + $0x114] ss:$8 sps:$4 sm:$0xff]   ;;  %v1579_v14 = vld [vmem:[#allocation5 + $0x110] ss:$8 sps:$4 sm:$0xff]  }
  0x51   :  { %v1576_v11 = vld [vmem:[#allocation5 + $0x300] ss:$8 sps:$4 sm:$0xff]   ;;  %v1584_v13 = vld [vmem:[#allocation5 + $0x314] ss:$8 sps:$4 sm:$0xff]   ;;  %v1582_v15 = vld [vmem:[#allocation5 + $0x310] ss:$8 sps:$4 sm:$0xff]  }
  0x52   :  { %904 = vmatpush1.bf16.msra.mxu1 %v1517_v26  ;;  %v1587_v16 = vld [vmem:[#allocation5 + $0x124] ss:$8 sps:$4 sm:$0xff]   ;;  %v1585_v18 = vld [vmem:[#allocation5 + $0x120] ss:$8 sps:$4 sm:$0xff]   ;;  %v1593_v20 = vld [vmem:[#allocation5 + $0x134] ss:$8 sps:$4 sm:$0xff]  }
  0x53   :  { %990 = vmatpush1.bf16.msra.mxu0 %v1518_v27  ;;  %905 = vmatprep.subr.bf16.mxu1 %v1519_v28  ;;  %v1590_v17 = vld [vmem:[#allocation5 + $0x324] ss:$8 sps:$4 sm:$0xff]   ;;  %v1588_v19 = vld [vmem:[#allocation5 + $0x320] ss:$8 sps:$4 sm:$0xff]   ;;  %v1596_v21 = vld [vmem:[#allocation5 + $0x334] ss:$8 sps:$4 sm:$0xff]  }
  0x54   :  { %991 = vmatprep.subr.bf16.mxu0 %v1521_v29  ;;  %v1591_v22 = vld [vmem:[#allocation5 + $0x130] ss:$8 sps:$4 sm:$0xff]   ;;  %v1599_v24 = vld [vmem:[#allocation5 + $0x144] ss:$8 sps:$4 sm:$0xff]   ;;  %v1597_v26 = vld [vmem:[#allocation5 + $0x140] ss:$8 sps:$4 sm:$0xff]  }
  0x55   :  { %v1594_v23 = vld [vmem:[#allocation5 + $0x330] ss:$8 sps:$4 sm:$0xff]   ;;  %v1602_v25 = vld [vmem:[#allocation5 + $0x344] ss:$8 sps:$4 sm:$0xff]   ;;  %v1600_v27 = vld [vmem:[#allocation5 + $0x340] ss:$8 sps:$4 sm:$0xff]  }
  0x56   :  { %906 = vmatpush1.bf16.msra.mxu1 %v1523_v30  ;;  %v1605_v28 = vld [vmem:[#allocation5 + $0x154] ss:$8 sps:$4 sm:$0xff]   ;;  %v1603_v30 = vld [vmem:[#allocation5 + $0x150] ss:$8 sps:$4 sm:$0xff]   ;;  %v1621_v48 = vld [vmem:[#allocation5 + $0x180] ss:$8 sps:$4 sm:$0xff]  }
  0x57   :  { %992 = vmatpush1.bf16.msra.mxu0 %v1524_v31  ;;  %907 = vmatprep.subr.bf16.mxu1 %v1525_v32  ;;  %v1608_v29 = vld [vmem:[#allocation5 + $0x354] ss:$8 sps:$4 sm:$0xff]   ;;  %v1606_v31 = vld [vmem:[#allocation5 + $0x350] ss:$8 sps:$4 sm:$0xff]   ;;  %v1611_v32 = vld [vmem:[#allocation5 + $0x164] ss:$8 sps:$4 sm:$0xff]  }
  0x58   :  { %993 = vmatprep.subr.bf16.mxu0 %v1527_v33  ;;  %v1614_v33 = vld [vmem:[#allocation5 + $0x364] ss:$8 sps:$4 sm:$0xff]   ;;  %v1624_v49 = vld [vmem:[#allocation5 + $0x380] ss:$8 sps:$4 sm:$0xff]   ;;  %v1627_v52 = vld [vmem:[#allocation5 + $0x190] ss:$8 sps:$4 sm:$0xff]  }
  0x59   :  { %v1630_v53 = vld [vmem:[#allocation5 + $0x390] ss:$8 sps:$4 sm:$0xff]   ;;  %v1635_v54 = vld [vmem:[#allocation5 + $0x1a4] ss:$8 sps:$4 sm:$0xff]  }
  0x5a   :  { %908 = vmatpush1.bf16.msra.mxu1 %v1529_v34  ;;  %v1609_v34 = vld [vmem:[#allocation5 + $0x160] ss:$8 sps:$4 sm:$0xff]   ;;  %v1638_v55 = vld [vmem:[#allocation5 + $0x3a4] ss:$8 sps:$4 sm:$0xff]  }
  0x5b   :  { %994 = vmatpush1.bf16.msra.mxu0 %v1530_v35  ;;  %909 = vmatprep.subr.bf16.mxu1 %v1531_v36  ;;  %v1612_v35 = vld [vmem:[#allocation5 + $0x360] ss:$8 sps:$4 sm:$0xff]  }
  0x5c   :  { %995 = vmatprep.subr.bf16.mxu0 %v1533_v37  ;;  %v1870_v36 = vld [vmem:[#allocation2 + $0x8] sm:$0xff] }
  0x5d   :  { %v1872_v37 = vld [vmem:[#allocation2 + $0x28] sm:$0xff] }
  0x5e   :  { %910 = vmatpush1.bf16.msra.mxu1 %v1535_v38  ;;  %v1874_v38 = vld [vmem:[#allocation2 + $0x18] sm:$0xff] }
  0x5f   :  { %996 = vmatpush1.bf16.msra.mxu0 %v1536_v39  ;;  %911 = vmatprep.subr.bf16.mxu1 %v1537_v40  ;;  %v1876_v39 = vld [vmem:[#allocation2 + $0x38] sm:$0xff] }
  0x60   :  { %997 = vmatprep.subr.bf16.mxu0 %v1539_v41  ;;  %v1617_v40 = vld [vmem:[#allocation5 + $0x174] ss:$8 sps:$4 sm:$0xff]   ;;  %v1279_v41 = vcombine.high %v1870_v36, %v1872_v37 }
  0x62   :  { %912 = vmatpush1.bf16.msra.mxu1 %v1541_v42  ;;  %v1620_v42 = vld [vmem:[#allocation5 + $0x374] ss:$8 sps:$4 sm:$0xff]  }
  0x63   :  { %998 = vmatpush1.bf16.msra.mxu0 %v1542_v43  ;;  %913 = vmatprep.subr.bf16.mxu1 %v1543_v44  ;;  %v1283_v43 = vcombine.high %v1874_v38, %v1876_v39  ;;  %v1615_v44 = vld [vmem:[#allocation5 + $0x170] ss:$8 sps:$4 sm:$0xff]  }
  0x64   :  { %999 = vmatprep.subr.bf16.mxu0 %v1545_v45  ;;  %v1618_v45 = vld [vmem:[#allocation5 + $0x370] ss:$8 sps:$4 sm:$0xff]  }
  0x66   :  { %914 = vmatpush1.bf16.msra.mxu1 %v1547_v46  ;;  %v1623_v46 = vld [vmem:[#allocation5 + $0x184] ss:$8 sps:$4 sm:$0xff]  }
  0x67   :  { %1000 = vmatpush1.bf16.msra.mxu0 %v1548_v47  ;;  %915 = vmatprep.subr.bf16.mxu1 %v1549_v50  ;;  %v1626_v47 = vld [vmem:[#allocation5 + $0x384] ss:$8 sps:$4 sm:$0xff]   ;;  %v1629_v50 = vld [vmem:[#allocation5 + $0x194] ss:$8 sps:$4 sm:$0xff]  }
  0x68   :  { %1001 = vmatprep.subr.bf16.mxu0 %v1551_v51  ;;  %v1632_v51 = vld [vmem:[#allocation5 + $0x394] ss:$8 sps:$4 sm:$0xff]  }
  0x6a   :  { %916 = vmatpush1.bf16.msra.mxu1 %v1553_v56  ;;  %v1633_v56 = vld [vmem:[#allocation5 + $0x1a0] ss:$8 sps:$4 sm:$0xff]  }
  0x6b   :  { %1002 = vmatpush1.bf16.msra.mxu0 %v1554_v57  ;;  %917 = vmatprep.subr.bf16.mxu1 %v1555_v58  ;;  %v1636_v57 = vld [vmem:[#allocation5 + $0x3a0] ss:$8 sps:$4 sm:$0xff]   ;;  %v1641_v58 = vld [vmem:[#allocation5 + $0x1b4] ss:$8 sps:$4 sm:$0xff]  }
  0x6c   :  { %1003 = vmatprep.subr.bf16.mxu0 %v1557_v59  ;;  %v1644_v59 = vld [vmem:[#allocation5 + $0x3b4] ss:$8 sps:$4 sm:$0xff]  }
  0x6e   :  { %918 = vmatpush1.bf16.msra.mxu1 %v1559_v60  ;;  %v1639_v60 = vld [vmem:[#allocation5 + $0x1b0] ss:$8 sps:$4 sm:$0xff]  }
  0x6f   :  { %1004 = vmatpush1.bf16.msra.mxu0 %v1560_v61  ;;  %919 = vmatprep.subr.bf16.mxu1 %v1561_v62  ;;  %v1642_v61 = vld [vmem:[#allocation5 + $0x3b0] ss:$8 sps:$4 sm:$0xff]   ;;  %v1647_v62 = vld [vmem:[#allocation5 + $0x1c4] ss:$8 sps:$4 sm:$0xff]  }
  0x70   :  { %1005 = vmatprep.subr.bf16.mxu0 %v1563_v63  ;;  %v1650_v63 = vld [vmem:[#allocation5 + $0x3c4] ss:$8 sps:$4 sm:$0xff]  }
  0x72   :  { %920 = vmatpush1.bf16.msra.mxu1 %v1565_v0  ;;  %v1645_v0 = vld [vmem:[#allocation5 + $0x1c0] ss:$8 sps:$4 sm:$0xff]  }
  0x73   :  { %1006 = vmatpush1.bf16.msra.mxu0 %v1566_v1  ;;  %921 = vmatprep.subr.bf16.mxu1 %v1567_v2  ;;  %v1648_v1 = vld [vmem:[#allocation5 + $0x3c0] ss:$8 sps:$4 sm:$0xff]   ;;  %v1653_v2 = vld [vmem:[#allocation5 + $0x1d4] ss:$8 sps:$4 sm:$0xff]  }
  0x74   :  { %1007 = vmatprep.subr.bf16.mxu0 %v1569_v3  ;;  %v1656_v3 = vld [vmem:[#allocation5 + $0x3d4] ss:$8 sps:$4 sm:$0xff]  }
  0x76   :  { %922 = vmatpush1.bf16.msra.mxu1 %v1571_v4  ;;  %v1651_v4 = vld [vmem:[#allocation5 + $0x1d0] ss:$8 sps:$4 sm:$0xff]  }
  0x77   :  { %1008 = vmatpush1.bf16.msra.mxu0 %v1572_v5  ;;  %934 = vmatprep.subr.bf16.mxu1 %v1575_v6  ;;  %v1654_v5 = vld [vmem:[#allocation5 + $0x3d0] ss:$8 sps:$4 sm:$0xff]   ;;  %v1659_v6 = vld [vmem:[#allocation5 + $0x1e4] ss:$8 sps:$4 sm:$0xff]  }
  0x78   :  { %1020 = vmatprep.subr.bf16.mxu0 %v1578_v7  ;;  %v1662_v7 = vld [vmem:[#allocation5 + $0x3e4] ss:$8 sps:$4 sm:$0xff]  }
  0x79   :  { %924 = vmatmul.mubr.bf16.vlgmr.msra.gmra.mrb[0].mxu1 %v1276_v8  ;;  %v1657_v8 = vld [vmem:[#allocation5 + $0x1e0] ss:$8 sps:$4 sm:$0xff]  }
  0x7a   :  { %1010 = vmatmul.mubr.bf16.vlgmr.msra.gmra.mrb[0].mxu0 %v1280_v10  ;;  %935 = vmatpush1.bf16.msra.mxu1 %v1573_v9  ;;  %v1660_v9 = vld [vmem:[#allocation5 + $0x3e0] ss:$8 sps:$4 sm:$0xff]   ;;  %v1665_v10 = vld [vmem:[#allocation5 + $0x1f4] ss:$8 sps:$4 sm:$0xff]  }
  0x7b   :  { %1021 = vmatpush1.bf16.msra.mxu0 %v1576_v11  ;;  %936 = vmatprep.subr.bf16.mxu1 %v1581_v12  ;;  %v1668_v11 = vld [vmem:[#allocation5 + $0x3f4] ss:$8 sps:$4 sm:$0xff]   ;;  %v1663_v12 = vld [vmem:[#allocation5 + $0x1f0] ss:$8 sps:$4 sm:$0xff]  }
  0x7c   :  { %1022 = vmatprep.subr.bf16.mxu0 %v1584_v13  ;;  %966 = vmatprep.mubr.bf16.mxu1 %v1279_v41  ;;  %v1666_v13 = vld [vmem:[#allocation5 + $0x3f0] ss:$8 sps:$4 sm:$0xff]  }
  0x7d   :  { %1052 = vmatprep.mubr.bf16.mxu0 %v1283_v43 }
  0x7e   :  { %937 = vmatpush1.bf16.msra.mxu1 %v1579_v14  ;;  %v1669_v14 = vld [vmem:[#allocation7 + $0x40] sm:$0xff]  }
  0x7f   :  { %1023 = vmatpush1.bf16.msra.mxu0 %v1582_v15  ;;  %938 = vmatprep.subr.bf16.mxu1 %v1587_v16  ;;  %v1278_v15 = vcombine.low %v1870_v36, %v1872_v37  ;;  %v1282_v16 = vcombine.low %v1874_v38, %v1876_v39 }
  0x80   :  { %1024 = vmatprep.subr.bf16.mxu0 %v1590_v17  ;;  %v1670_v17 = vld [vmem:[#allocation7] sm:$0xff]  }
  0x82   :  { %939 = vmatpush1.bf16.msra.mxu1 %v1585_v18  ;;  %v1671_v18 = vld [vmem:[#allocation7 + $0x48] sm:$0xff]  }
  0x83   :  { %1025 = vmatpush1.bf16.msra.mxu0 %v1588_v19  ;;  %940 = vmatprep.subr.bf16.mxu1 %v1593_v20  ;;  %v1672_v19 = vld [vmem:[#allocation7 + $0x8] sm:$0xff]   ;;  %v1673_v20 = vld [vmem:[#allocation7 + $0x50] sm:$0xff]  }
  0x84   :  { %1026 = vmatprep.subr.bf16.mxu0 %v1596_v21  ;;  %v1674_v21 = vld [vmem:[#allocation7 + $0x10] sm:$0xff]  }
  0x86   :  { %941 = vmatpush1.bf16.msra.mxu1 %v1591_v22  ;;  %v1675_v22 = vld [vmem:[#allocation7 + $0x58] sm:$0xff]  }
  0x87   :  { %1027 = vmatpush1.bf16.msra.mxu0 %v1594_v23  ;;  %942 = vmatprep.subr.bf16.mxu1 %v1599_v24  ;;  %v1676_v23 = vld [vmem:[#allocation7 + $0x18] sm:$0xff]   ;;  %v1677_v24 = vld [vmem:[#allocation7 + $0x60] sm:$0xff]  }
  0x88   :  { %1028 = vmatprep.subr.bf16.mxu0 %v1602_v25  ;;  %v1678_v25 = vld [vmem:[#allocation7 + $0x20] sm:$0xff]  }
  0x8a   :  { %943 = vmatpush1.bf16.msra.mxu1 %v1597_v26  ;;  %v1679_v26 = vld [vmem:[#allocation7 + $0x68] sm:$0xff]  }
  0x8b   :  { %1029 = vmatpush1.bf16.msra.mxu0 %v1600_v27  ;;  %944 = vmatprep.subr.bf16.mxu1 %v1605_v28  ;;  %v1680_v27 = vld [vmem:[#allocation7 + $0x28] sm:$0xff]   ;;  %v1681_v28 = vld [vmem:[#allocation7 + $0x70] sm:$0xff]  }
  0x8c   :  { %1030 = vmatprep.subr.bf16.mxu0 %v1608_v29  ;;  %v1682_v29 = vld [vmem:[#allocation7 + $0x30] sm:$0xff]  }
  0x8e   :  { %945 = vmatpush1.bf16.msra.mxu1 %v1603_v30  ;;  %v1683_v30 = vld [vmem:[#allocation7 + $0x78] sm:$0xff]  }
  0x8f   :  { %1031 = vmatpush1.bf16.msra.mxu0 %v1606_v31  ;;  %946 = vmatprep.subr.bf16.mxu1 %v1611_v32  ;;  %v1684_v31 = vld [vmem:[#allocation7 + $0x38] sm:$0xff]   ;;  %v201_v32 = vlaneseq }
  0x90   :  { %1032 = vmatprep.subr.bf16.mxu0 %v1614_v33 }
  0x91   :  { %v202_v33 = vshrl.u32 %v201_v32, 7 }
  0x92   :  { %947 = vmatpush1.bf16.msra.mxu1 %v1609_v34 }
  0x93   :  { %1033 = vmatpush1.bf16.msra.mxu0 %v1612_v35  ;;  %948 = vmatprep.subr.bf16.mxu1 %v1617_v40  ;;  %v203_v34 = vsub.s32 0, %v202_v33  ;;  %v199_v35 = vld [vmem:[%s1909_s2] sm:$0x3]  ;;  %v207_v36 = vsub.s32 1, %v202_v33 }
  0x94   :  { %1034 = vmatprep.subr.bf16.mxu0 %v1620_v42 }
  0x95   :  { %v204_v37 = vrot.slane %v199_v35, %v203_v34  ;;  %v208_v38 = vrot.slane %v199_v35, %v207_v36 }
  0x96   :  { %949 = vmatpush1.bf16.msra.mxu1 %v1615_v44 }
  0x97   :  { %1035 = vmatpush1.bf16.msra.mxu0 %v1618_v45  ;;  %950 = vmatprep.subr.bf16.mxu1 %v1623_v46 }
  0x98   :  { %1036 = vmatprep.subr.bf16.mxu0 %v1626_v47 }
  0x9a   :  { %951 = vmatpush1.bf16.msra.mxu1 %v1621_v48 }
  0x9b   :  { %1037 = vmatpush1.bf16.msra.mxu0 %v1624_v49  ;;  %952 = vmatprep.subr.bf16.mxu1 %v1629_v50 }
  0x9c   :  { %1038 = vmatprep.subr.bf16.mxu0 %v1632_v51 }
  0x9e   :  { %953 = vmatpush1.bf16.msra.mxu1 %v1627_v52 }
  0x9f   :  { %1039 = vmatpush1.bf16.msra.mxu0 %v1630_v53  ;;  %954 = vmatprep.subr.bf16.mxu1 %v1635_v54 }
  0xa0   :  { %1040 = vmatprep.subr.bf16.mxu0 %v1638_v55 }
  0xa2   :  { %955 = vmatpush1.bf16.msra.mxu1 %v1633_v56 }
  0xa3   :  { %1041 = vmatpush1.bf16.msra.mxu0 %v1636_v57  ;;  %956 = vmatprep.subr.bf16.mxu1 %v1641_v58 }
  0xa4   :  { %1042 = vmatprep.subr.bf16.mxu0 %v1644_v59 }
  0xa6   :  { %957 = vmatpush1.bf16.msra.mxu1 %v1639_v60 }
  0xa7   :  { %1043 = vmatpush1.bf16.msra.mxu0 %v1642_v61  ;;  %958 = vmatprep.subr.bf16.mxu1 %v1647_v62  ;;  %v1412_v62 = vld [vmem:[%s1911_s4] ss:$0 sm:$0xff]  ;;  %s1763_s4 = scalar_lea.vmem %s1264_s13, 256 }
  0xa8   :  { %1044 = vmatprep.subr.bf16.mxu0 %v1650_v63  ;;  %p1764_p10 = scmp.ne.s32.totalorder %s1264_s13, %s1763_s4  ;;  %p1769_p12 = scmp.lt.s32.totalorder %s1763_s4, %s1763_s4 }
  0xaa   :  { %959 = vmatpush1.bf16.msra.mxu1 %v1645_v0  ;;  %p1770_p13 = por %p1769_p12, %p1768_p11 }
  0xab   :  { %1045 = vmatpush1.bf16.msra.mxu0 %v1648_v1  ;;  %960 = vmatprep.subr.bf16.mxu1 %v1653_v2 }
  0xac   :  { %1046 = vmatprep.subr.bf16.mxu0 %v1656_v3  ;;  %p1771_p0 = pnand %p1770_p13, %p1764_p10 }
  0xae   :  { %961 = vmatpush1.bf16.msra.mxu1 %v1651_v4 }
  0xaf   :  { %1047 = vmatpush1.bf16.msra.mxu0 %v1654_v5  ;;  %962 = vmatprep.subr.bf16.mxu1 %v1659_v6 }
  0xb0   :  { %1048 = vmatprep.subr.bf16.mxu0 %v1662_v7 }
  0xb2   :  { %963 = vmatpush1.bf16.msra.mxu1 %v1657_v8 }
  0xb3   :  { %1049 = vmatpush1.bf16.msra.mxu0 %v1660_v9  ;;  %964 = vmatprep.subr.bf16.mxu1 %v1665_v10  ;;  %v1246_v10 = vand.u32 127, %v201_v32 }
  0xb4   :  { %1050 = vmatprep.subr.bf16.mxu0 %v1668_v11 }
  0xb5   :  { %vm1247_vm0 = vcmp.lt.s32.totalorder %v1246_v10, 64 }
  0xb6   :  { %965 = vmatpush1.bf16.msra.mxu1 %v1663_v12 }
  0xb7   :  { %1051 = vmatpush1.bf16.msra.mxu0 %v1666_v13  ;;  %1429 = vmatprep.subr.bf16.mxu1 %v1669_v14 }
  0xb9   :  { %967 = vmatmul.mubr.bf16.vlgmr.msra.gmra.mrb[0].mxu1 %v1278_v15 }
  0xba   :  { %1053 = vmatmul.mubr.bf16.vlgmr.msra.gmra.mrb[0].mxu0 %v1282_v16  ;;  %1430 = vmatpush3.bf16.msra.mxu1 %v1670_v17 }
  0xbb   :  { %1431 = vmatprep.subr.bf16.mxu1 %v1671_v18 }
  0xbe   :  { %1432 = vmatpush3.bf16.msra.mxu1 %v1672_v19 }
  0xbf   :  { %1433 = vmatprep.subr.bf16.mxu1 %v1673_v20 }
  0xc2   :  { %1434 = vmatpush3.bf16.msra.mxu1 %v1674_v21 }
  0xc3   :  { %1435 = vmatprep.subr.bf16.mxu1 %v1675_v22 }
  0xc6   :  { %1436 = vmatpush3.bf16.msra.mxu1 %v1676_v23 }
  0xc7   :  { %1437 = vmatprep.subr.bf16.mxu1 %v1677_v24 }
  0xca   :  { %1438 = vmatpush3.bf16.msra.mxu1 %v1678_v25 }
  0xcb   :  { %1439 = vmatprep.subr.bf16.mxu1 %v1679_v26 }
  0xce   :  { %1440 = vmatpush3.bf16.msra.mxu1 %v1680_v27 }
  0xcf   :  { %1441 = vmatprep.subr.bf16.mxu1 %v1681_v28 }
  0xd2   :  { %1442 = vmatpush3.bf16.msra.mxu1 %v1682_v29 }
  0xd3   :  { %1443 = vmatprep.subr.bf16.mxu1 %v1683_v30 }
  0xd6   :  { %1444 = vmatpush3.bf16.msra.mxu1 %v1684_v31 }
 0x18c   :  { %v968_v39 = vpop.f32.mrb[0].mxu1 }
 0x18d   :  { %v1054_v40 = vpop.f32.mrb[0].mxu0  ;;  %v1451_v41 = vadd.f32 %v968_v39, %v204_v37  ;;  %v970_v42 = vpop.f32.mrb[1].mxu1 }
 0x18e   :  { %v1056_v43 = vpop.f32.mrb[1].mxu0  ;;  %v1453_v44 = vadd.f32 %v970_v42, %v208_v38  ;;  %v972_v45 = vpop.f32.mrb[2].mxu1 }
 0x18f   :  { %v1058_v46 = vpop.f32.mrb[2].mxu0  ;;  %v1452_v47 = vadd.f32 %v1451_v41, %v1054_v40  ;;  %v1455_v48 = vadd.f32 %v972_v45, %v204_v37  ;;  %v974_v49 = vpop.f32.mrb[3].mxu1 }
 0x190   :  { %v1060_v50 = vpop.f32.mrb[3].mxu0  ;;  %v1454_v51 = vadd.f32 %v1453_v44, %v1056_v43  ;;  %v1457_v52 = vadd.f32 %v974_v49, %v208_v38 }
 0x191   :  { %1685 = vtanh.f32 %v1452_v47  ;;  %v1456_v53 = vadd.f32 %v1455_v48, %v1058_v46 }
 0x192   :  { %1687 = vtanh.f32 %v1454_v51  ;;  %v1458_v54 = vadd.f32 %v1457_v52, %v1060_v50 }
 0x193   :  { %1689 = vtanh.f32 %v1456_v53 }
 0x194   :  { %1691 = vtanh.f32 %v1458_v54 }
 0x19b   :  { %v1686_v55 = vpop.eup %1685 }
 0x19c   :  { %v1688_v56 = vpop.eup %1687 }
 0x19d   :  { %v1690_v57 = vpop.eup %1689 }
 0x19e   :  { %v1692_v58 = vpop.eup %1691  ;;  %v1067_v59 = vpack.c.bf16 %v1690_v57, %v1686_v55 }
 0x19f   :  { %v1068_v60 = vpack.c.bf16 %v1692_v58, %v1688_v56 }
 0x1a1   :  { %1236 = vmatprep.mubr.bf16.mxu1 %v1068_v60 }
 0x1a2   :  { %1237 = vmatmul.mubr.bf16.vlgmr.msra.gmra.mrb[4].mxu1 %v1067_v59 }
 0x275   :  { %v1445_v61 = vpop.f32.mrb[4].mxu1 }
 0x276   :  { %v1446_v63 = vpop.f32.mrb[5].mxu1 }
 0x277   :  { %v1447_v0 = vadd.f32 %v1446_v63, %v1445_v61  ;;  %v1448_v1 = vpop.f32.mrb[6].mxu1 }
 0x278   :  { %v1449_v2 = vpop.f32.mrb[7].mxu1 }
 0x279   :  { %v1239_v3 = vadd.f32 %v1447_v0, %v1412_v62  ;;  %v1450_v4 = vadd.f32 %v1449_v2, %v1448_v1 }
 0x27b   :  { %v1248_v5 = vmul.f32 0.5, %v1239_v3  ;;  %v1242_v6 = vadd.f32 %v1450_v4, %v1412_v62 }
 0x27d   :  { %v1250_v7 = vmul.f32 1.442695, %v1248_v5  ;;  %v1249_v8 = vmul.f32 0.5, %v1242_v6 }
 0x27f   :  { %1693 = vpow2.f32 %v1250_v7  ;;  %v1252_v9 = vmul.f32 1.442695, %v1249_v8 }
 0x281   :  { %1695 = vpow2.f32 %v1252_v9 }
 0x289   :  { %v1694_v11 = vpop.eup %1693 }
 0x28a   :  { %v1254_v12 = vsel %vm1247_vm0, %v1239_v3, %v1694_v11 }
 0x28b   :  { %v1696_v13 = vpop.eup %1695  ;;  %1256 = vst [vmem:[#allocation8] sm:$0xff] %v1254_v12 }
 0x28c   :  { %v1255_v14 = vsel %vm1247_vm0, %v1242_v6, %v1696_v13 }
 0x28d   :  { %1257 = vst [vmem:[#allocation8 + $0x8] sm:$0xff] %v1255_v14 }
 0x28e   :  { %1774 = shalt.err (!%p1771_p0)
}
 0x28f   :  { %s1775_s16 = scalar_lea.hbm %s1912_s5, 256 }
 0x290   :  { %p1776_p1 = scmp.ne.s32.totalorder %s1912_s5, %s1775_s16  ;;  %p1779_p2 = scmp.lt.u32.totalorder %s1775_s16, %s1912_s5 }
 0x292   :  { %p1781_p3 = pnand %p1779_p2, %p1776_p1 }
 0x294   :  { %1784 = shalt.err (!%p1781_p3)
}
 0x295   :  { %1269 = dma.vmem_to_hbm [thread:$0]  %s1264_s13, 256, %s1912_s5, [#allocation4], %s1792_s28, %s1792_s28, %s1793_s29  }
 0x296   :  { %1789 = dma.done.wait [#allocation4], 256  }
 0x297   :  { %1790 = vsyncadd [#allocation4], 4294967040 }
 0x298   :  { %1273 = vsyncpa [#allocation3], 1 }
 0x299   :  { %1274 = vsyncpa [#allocation6], 1 }
 0x29a   :  { %1275 = vsyncpa [#allocation4], 1 }

</bundles_post_ra>
